<compile_context>
chip_gen: v6e
topology: v6e:2x2x1
jax: 0.10.0
libtpu: 0.0.40
codegen_flags: <defaults>
</compile_context>

<pallas_src>
import math

import jax
import jax.numpy as jnp
from jax.experimental import pallas as pl
from jax.experimental.pallas import tpu as pltpu

_C = math.sqrt(2.0 / math.pi)      # sqrt(2/pi)
_C3 = _C * 0.044715                # folded cubic coefficient
_LANES = 128
_VMEM_LIMIT = 40 << 20             # safe on v5e/v6e (128 MiB) and v7x (64 MiB)
_MIN_SPLIT_BYTES = 1 << 20         # force >=4 grid steps above this size


def _gelu_kernel(x_ref, o_ref):
    x = x_ref[...]
    # Compute in f32 registers regardless of storage dtype (PyTorch opmath);
    # HBM/VMEM tiles stay in the input dtype.
    xf = x.astype(jnp.float32)
    inner = _C * xf + _C3 * (xf * xf * xf)
    y = (0.5 * xf) * (1.0 + jnp.tanh(inner))
    o_ref[...] = y.astype(o_ref.dtype)


def _sublane_multiple(dtype) -> int:
    itemsize = jnp.dtype(dtype).itemsize
    if itemsize >= 4:
        return 8
    if itemsize == 2:
        return 16
    return 32


def _target_block_bytes() -> int:
    """Per-chip block target: 8 MiB on v7x (3.2 TB/s HBM, 64 MiB VMEM/TC),
    4 MiB on v5e/v6e (already near their measured roofline plateau)."""
    try:
        vmem = getattr(pltpu.get_tpu_info(), "vmem_capacity_bytes", None)
    except Exception:  # unknown chip / interpret mode
        vmem = None
    if vmem is not None and vmem <= (64 << 20):
        return 8 << 20
    return 4 << 20


def _launch(x_arr, block_shape, grid, index_map):
    return pl.pallas_call(
        _gelu_kernel,
        out_shape=jax.ShapeDtypeStruct(x_arr.shape, x_arr.dtype),
        grid_spec=pltpu.PrefetchScalarGridSpec(
            num_scalar_prefetch=0,
            grid=grid,
            in_specs=[pl.BlockSpec(block_shape, index_map)],
            out_specs=pl.BlockSpec(block_shape, index_map),
        ),
        compiler_params=pltpu.CompilerParams(
            dimension_semantics=("parallel",),
            vmem_limit_bytes=_VMEM_LIMIT,
        ),
    )(x_arr)


def gelu(x, *, block_bytes=None):
    """Tanh-approximation GELU, matching the PyTorch module's forward."""
    orig_shape = x.shape
    dtype = x.dtype
    n = x.size
    if n == 0:
        return x

    itemsize = jnp.dtype(dtype).itemsize
    if block_bytes is None:
        block_bytes = _target_block_bytes()

    x_flat = jnp.ravel(x)
    total_bytes = n * itemsize

    if n % _LANES == 0:
        # Copy-free fast path: (rows, 128) slab, lane-dense loads/stores.
        rows = n // _LANES
        sub = _sublane_multiple(dtype)
        tr = max(sub, block_bytes // (_LANES * itemsize))
        rows_rounded = pl.cdiv(rows, sub) * sub
        tr = min(tr, rows_rounded)
        if total_bytes >= _MIN_SPLIT_BYTES:
            # >=4 grid steps: lets v7x shard across both TensorCores and gives
            # the DMA pipeline something to overlap with.
            quarter = max(sub, pl.cdiv(pl.cdiv(rows, 4), sub) * sub)
            tr = min(tr, quarter)
        grid = (pl.cdiv(rows, tr),)
        out2d = _launch(x_flat.reshape(rows, _LANES), (tr, _LANES), grid,
                        lambda i: (i, 0))
        out_flat = out2d.reshape(-1)
    else:
        # Ragged total size: run the flat 1-D array directly.  Pallas masks the
        # partial final block, so there is no pad/slice HBM pass at all.
        gran = 8 * _LANES  # keep blocks sublane*lane aligned
        be = max(gran, (block_bytes // itemsize) // gran * gran)
        n_rounded = pl.cdiv(n, gran) * gran
        be = min(be, n_rounded)
        if total_bytes >= _MIN_SPLIT_BYTES:
            quarter = max(gran, pl.cdiv(pl.cdiv(n, 4), gran) * gran)
            be = min(be, quarter)
        grid = (pl.cdiv(n, be),)
        out_flat = _launch(x_flat, (be,), grid, lambda i: (i,))

    return out_flat.reshape(orig_shape)


def gelu_ref(x):
    # Pure-JAX reference identical to the PyTorch forward (f32 opmath).
    xf = x.astype(jnp.float32)
    c = jnp.float32(_C)
    y = 0.5 * xf * (1.0 + jnp.tanh(c * (xf + 0.044715 * jnp.power(xf, 3))))
    return y.astype(x.dtype)


if __name__ == "__main__":
    # Primary (module-consistent) input: NCHW-style activation, lane-multiple.
    x = jax.random.normal(jax.random.PRNGKey(0), (2, 4, 16, 16), dtype=jnp.float32)
    out = gelu(x)
    jax.block_until_ready(out)
    assert out.shape == x.shape and out.dtype == x.dtype
    assert jnp.allclose(out, gelu_ref(x), atol=1e-5, rtol=1e-5), "f32 mismatch"

    # Ragged total size (not a multiple of 128): exercises the pad-free 1-D path.
    x_rag = jax.random.normal(jax.random.PRNGKey(1), (3, 5, 37, 29), dtype=jnp.float32)
    out_rag = gelu(x_rag)
    jax.block_until_ready(out_rag)
    assert jnp.allclose(out_rag, gelu_ref(x_rag), atol=1e-5, rtol=1e-5), "ragged mismatch"

    # bf16: storage stays bf16 (half the HBM traffic), math in f32 registers.
    x_bf = jax.random.normal(jax.random.PRNGKey(2), (2, 8, 256), dtype=jnp.bfloat16)
    out_bf = gelu(x_bf)
    jax.block_until_ready(out_bf)
    assert out_bf.dtype == jnp.bfloat16
    assert jnp.allclose(out_bf.astype(jnp.float32),
                        gelu_ref(x_bf).astype(jnp.float32),
                        atol=2e-2, rtol=2e-2), "bf16 mismatch"

    # 1 MiB input: exercises the >=4-step grid split (megacore + pipelining).
    x_med = jax.random.normal(jax.random.PRNGKey(3), (512, 512), dtype=jnp.float32)
    out_med = gelu(x_med)
    jax.block_until_ready(out_med)
    assert jnp.allclose(out_med, gelu_ref(x_med), atol=1e-5, rtol=1e-5), "medium mismatch"

    print("KERNEL_OK")
</pallas_src>

<mosaic_0001>
module attributes {stable_mosaic.version = 11 : i64} {
  func.func @_gelu_kernel(%arg0: i32, %arg1: memref<16x128xf32, #tpu.memory_space<vmem>>, %arg2: memref<16x128xf32, #tpu.memory_space<vmem>>) attributes {dimension_semantics = [#tpu.dimension_semantics<parallel>], iteration_bounds = array<i64: 1>, scalar_prefetch = 0 : i64, scratch_operands = 0 : i64, tpu.core_type = #tpu.core_type<tc>, window_params = [{transform_indices = @transform_0, window_bounds = array<i64: 16, 128>}, {transform_indices = @transform_1, window_bounds = array<i64: 16, 128>}]} {
    %c0 = arith.constant 0 : index
    %c0_0 = arith.constant 0 : index
    %0 = vector.load %arg1[%c0, %c0_0] : memref<16x128xf32, #tpu.memory_space<vmem>>, vector<16x128xf32>
    %cst = arith.constant 0.797884583 : f32
    %1 = vector.broadcast %cst : f32 to vector<16x128xf32>
    %2 = arith.mulf %1, %0 : vector<16x128xf32>
    %3 = arith.mulf %0, %0 : vector<16x128xf32>
    %4 = arith.mulf %3, %0 : vector<16x128xf32>
    %cst_1 = arith.constant 0.0356774069 : f32
    %5 = vector.broadcast %cst_1 : f32 to vector<16x128xf32>
    %6 = arith.mulf %5, %4 : vector<16x128xf32>
    %7 = arith.addf %2, %6 : vector<16x128xf32>
    %cst_2 = arith.constant 5.000000e-01 : f32
    %8 = vector.broadcast %cst_2 : f32 to vector<16x128xf32>
    %9 = arith.mulf %8, %0 : vector<16x128xf32>
    %10 = math.tanh %7 : vector<16x128xf32>
    %cst_3 = arith.constant 1.000000e+00 : f32
    %11 = vector.broadcast %cst_3 : f32 to vector<16x128xf32>
    %12 = arith.addf %11, %10 : vector<16x128xf32>
    %13 = arith.mulf %9, %12 : vector<16x128xf32>
    %c0_4 = arith.constant 0 : index
    %c0_5 = arith.constant 0 : index
    %14 = vector.load %arg2[%c0_4, %c0_5] : memref<16x128xf32, #tpu.memory_space<vmem>>, vector<16x128xf32>
    tpu.vector_store %arg2[%c0_4, %c0_5], %13 {strides = array<i32>} : memref<16x128xf32, #tpu.memory_space<vmem>>, vector<16x128xf32>,
    return
  }
  func.func @transform_0(%arg0: i32) -> (i32, i32) {
    %c0_i32 = arith.constant 0 : i32
    %c0_i32_0 = arith.constant 0 : i32
    return %arg0, %c0_i32 : i32, i32
  }
  func.func @transform_1(%arg0: i32) -> (i32, i32) {
    %c0_i32 = arith.constant 0 : i32
    %c0_i32_0 = arith.constant 0 : i32
    return %arg0, %c0_i32 : i32, i32
  }
}

</mosaic_0001>

<bundles_post_ra>
// kernel: tpu_custom_call.1
= control target key start
LH: loop header
LB: loop body
LE: loop exit
PB: predicated region body
PF: predicated region fallthrough
CT: control target
= control target key end

     0   :  { %6 = vsyncpa [#allocation3], 0  ;;  %s140_s0 = inlined_call_operand.hbm [shape: f32[16,128], index: 0, kind: input, shape index: {}]   ;;  %s141_s1 = inlined_call_operand.hbm [shape: f32[16,128], index: 1, kind: output, shape index: {}]  }
   0x1   :  { %7 = vsyncpa [#allocation4], 0  ;;  %s114_s6 = smov [#allocation2]  }
   0x2   :  { %s13_s7 = sshll.u32 %s114_s6, 4  ;;  %s14_s7 = int_to_ptr.vmem [resolvable:$true] %s13_s7 }
   0x3   :  { %s78_s8 = scalar_lea.vmem %s14_s7, 256  ;;  %p83_p1 = scmp.lt.s32.totalorder %s14_s7, %s14_s7 }
   0x4   :  { %p79_p0 = scmp.ne.s32.totalorder %s14_s7, %s78_s8  ;;  %p84_p2 = scmp.lt.s32.totalorder %s78_s8, %s78_s8 }
   0x6   :  { %p85_p3 = por %p84_p2, %p83_p1 }
   0x8   :  { %p86_p4 = pnand %p85_p3, %p79_p0 }
   0xa   :  { %89 = shalt.err (!%p86_p4)
}
   0xb   :  { %s115_s9 = smov 128   ;;  %s116_s10 = smov 8  }
   0xc   :  { %19 = dma.hbm_to_vmem [thread:$0]  %s140_s0, 256, %s14_s7, [#allocation3], %s115_s9, %s115_s9, %s116_s10  }
   0xd   :  { %110 = dma.done.wait [#allocation3], 256  }
   0xe   :  { %111 = vsyncadd [#allocation3], 4294967040  ;;  %v23_v0 = vld [vmem:[#allocation2] sm:$0xff]  ;;  %v24_v1 = vld [vmem:[#allocation2 + $0x8] sm:$0xff]  ;;  %s117_s0 = smov [#allocation5]  }
   0xf   :  { %v27_v2 = vmul.f32 %v23_v0, %v23_v0  ;;  %v28_v3 = vmul.f32 %v24_v1, %v24_v1  ;;  %v25_v4 = vmul.f32 0.7978846, %v23_v0  ;;  %v26_v6 = vmul.f32 0.7978846, %v24_v1  ;;  %s50_s13 = sshll.u32 %s117_s0, 4  ;;  %s51_s13 = int_to_ptr.vmem [resolvable:$true] %s50_s13 }
  0x10   :  { %v35_v12 = vmul.f32 0.5, %v23_v0  ;;  %v36_v14 = vmul.f32 0.5, %v24_v1  ;;  %s90_s14 = scalar_lea.vmem %s51_s13, 256  ;;  %p95_p6 = scmp.lt.s32.totalorder %s51_s13, %s51_s13 }
  0x11   :  { %v29_v5 = vmul.f32 %v27_v2, %v23_v0  ;;  %v30_v7 = vmul.f32 %v28_v3, %v24_v1  ;;  %p91_p5 = scmp.ne.s32.totalorder %s51_s13, %s90_s14  ;;  %p96_p7 = scmp.lt.s32.totalorder %s90_s14, %s90_s14 }
  0x13   :  { %v31_v8 = vmul.f32 0.035677407, %v29_v5  ;;  %v32_v9 = vmul.f32 0.035677407, %v30_v7  ;;  %p97_p8 = por %p96_p7, %p95_p6 }
  0x15   :  { %v33_v10 = vadd.f32 %v31_v8, %v25_v4  ;;  %v34_v11 = vadd.f32 %v32_v9, %v26_v6  ;;  %p98_p9 = pnand %p97_p8, %p91_p5 }
  0x17   :  { %66 = vtanh.f32 %v33_v10 }
  0x18   :  { %68 = vtanh.f32 %v34_v11 }
  0x24   :  { %v67_v13 = vpop.eup %66 }
  0x25   :  { %v69_v15 = vpop.eup %68  ;;  %v39_v16 = vadd.f32 1.0, %v67_v13 }
  0x26   :  { %v40_v17 = vadd.f32 1.0, %v69_v15 }
  0x27   :  { %v41_v18 = vmul.f32 %v39_v16, %v35_v12 }
  0x28   :  { %v42_v19 = vmul.f32 %v40_v17, %v36_v14 }
  0x29   :  { %43 = vst [vmem:[#allocation5] sm:$0xff] %v41_v18 }
  0x2a   :  { %44 = vst [vmem:[#allocation5 + $0x8] sm:$0xff] %v42_v19 }
  0x2b   :  { %101 = shalt.err (!%p98_p9)
}
  0x2c   :  { %56 = dma.vmem_to_hbm [thread:$0]  %s51_s13, 256, %s141_s1, [#allocation4], %s115_s9, %s115_s9, %s116_s10  }
  0x2d   :  { %112 = dma.done.wait [#allocation4], 256  }
  0x2e   :  { %113 = vsyncadd [#allocation4], 4294967040 }
  0x2f   :  { %60 = vsyncpa [#allocation3], 1 }
  0x30   :  { %61 = vsyncpa [#allocation4], 1 }

</bundles_post_ra>
